<compile_context>
chip_gen: v6e
topology: v6e:2x2x1
jax: 0.10.0
libtpu: 0.0.40
codegen_flags: <defaults>
</compile_context>

<pallas_src>
import jax
import jax.numpy as jnp
from jax.experimental import pallas as pl
from jax.experimental.pallas import tpu as pltpu

_LANE = 128


# --------------------------------------------------------------------------
# Planning helpers (all pure-Python, run at trace time on static shapes).
# --------------------------------------------------------------------------
def _vmem_plan():
    """Return (working-set budget, vmem_limit_bytes), sized per TPU generation."""
    try:
        cap = int(pltpu.get_tpu_info().vmem_capacity_bytes)
    except Exception:
        cap = 64 * 1024 * 1024  # conservative fallback (v7x-sized VMEM)
    limit = min((cap * 3) // 4, cap - (8 << 20))   # stay well below physical
    limit = max(limit, 16 << 20)
    budget = limit // 2                            # double-buffered working set
    return budget, limit


def _plan_tiles(R, PH, CH, B, budget):
    """Pick (ch_chunk, row_tile) for blocks of shape (.., row_tile, 128)."""
    row_bytes = _LANE * 4  # one f32 plane row of 128 lanes

    def working_set(tc, tr):
        # image planes (2*PH) + csm planes (2*tc) + output planes (2*PH*tc),
        # each double-buffered by the pipeline.
        planes = 2 * PH + 2 * tc + 2 * PH * tc
        return 2 * planes * tr * row_bytes

    # CH chunk: largest divisor of CH whose minimal (tr=8) working set fits.
    tc = CH
    while tc > 1 and working_set(tc, 8) > budget:
        tc -= 1
        while CH % tc:
            tc -= 1
    nc = CH // tc

    # Row tile: largest multiple of 8 rows that fits the budget.
    planes = 2 * PH + 2 * tc + 2 * PH * tc
    tr = budget // (2 * planes * row_bytes)
    tr = max(8, (tr // 8) * 8)

    # Keep enough grid steps for dual-TC sharding (v7x) / pipeline overlap.
    min_steps = 8
    if B * nc * pl.cdiv(R, tr) < min_steps and R > 8:
        want_tiles = pl.cdiv(min_steps, B * nc)
        tr = min(tr, max(8, ((pl.cdiv(R, want_tiles) + 7) // 8) * 8))

    if tr >= R:
        tr = R  # single row tile; a full-extent block is always legal
    return tc, tr


# --------------------------------------------------------------------------
# Kernel
# --------------------------------------------------------------------------
def _csm_mul_kernel(img_r_ref, img_i_ref, csm_r_ref, csm_i_ref,
                    out_r_ref, out_i_ref):
    # img_*: (PH, TR, 128)   csm_*: (TC, TR, 128)   out_*: (PH, TC, TR, 128)
    c = csm_r_ref[...]
    d = csm_i_ref[...]
    ph_count = img_r_ref.shape[0]
    # Unrolled loop over PH keeps broadcast temporaries at (TC, TR, 128) size
    # instead of (PH, TC, TR, 128), so nothing big materializes in VMEM.
    for ph in range(ph_count):
        a = img_r_ref[ph][None, :, :]   # (1, TR, 128)
        b = img_i_ref[ph][None, :, :]
        out_r_ref[ph] = a * c - b * d   # (TC, TR, 128)
        out_i_ref[ph] = a * d + b * c


# --------------------------------------------------------------------------
# Wrappers
# --------------------------------------------------------------------------
def _csm_fixph_planar(image, csm_r, csm_i):
    """image: (B, PH, D, H, W) complex64; csm_*: (Bc, CH, R, 128) float32.

    Returns planar real/imag outputs of shape (B, PH, CH, R, 128) float32.
    """
    B, PH, D, H, W = image.shape
    Bc, CH, R, lane = csm_r.shape
    assert lane == _LANE
    assert Bc in (1, B), "csm batch must be 1 or match image batch"
    S = D * H * W
    pad = R * _LANE - S
    assert 0 <= pad < _LANE, "csm spatial size mismatch"

    # Deinterleave the complex image into f32 planes (one fused XLA pass);
    # avoid any padding copy when S is already lane-aligned.
    img = image.reshape(B, PH, S)
    img_r = jnp.real(img).astype(jnp.float32)
    img_i = jnp.imag(img).astype(jnp.float32)
    if pad:
        img_r = jnp.pad(img_r, ((0, 0), (0, 0), (0, pad)))
        img_i = jnp.pad(img_i, ((0, 0), (0, 0), (0, pad)))
    img_r = img_r.reshape(B, PH, R, _LANE)
    img_i = img_i.reshape(B, PH, R, _LANE)

    budget, vmem_limit = _vmem_plan()
    tc, tr = _plan_tiles(R, PH, CH, B, budget)
    nc = CH // tc
    num_tiles = pl.cdiv(R, tr)

    # Grid = (row_tile, ch_chunk, batch); batch innermost so a batch-1 csm
    # block index is constant across consecutive steps (no re-DMA).
    img_spec = pl.BlockSpec((None, PH, tr, _LANE),
                            lambda t, c, b: (b, 0, t, 0))
    if Bc == 1:
        csm_map = lambda t, c, b: (0, c, t, 0)
    else:
        csm_map = lambda t, c, b: (b, c, t, 0)
    csm_spec = pl.BlockSpec((None, tc, tr, _LANE), csm_map)
    out_spec = pl.BlockSpec((None, PH, tc, tr, _LANE),
                            lambda t, c, b: (b, 0, c, t, 0))

    out_elems = B * PH * CH * R * _LANE
    cost = pl.CostEstimate(
        flops=6 * out_elems,          # 4 mul + 2 add per complex output elem
        transcendentals=0,
        bytes_accessed=4 * (2 * B * PH * R * _LANE
                            + 2 * Bc * CH * R * _LANE
                            + 2 * out_elems),
    )

    out_r, out_i = pl.pallas_call(
        _csm_mul_kernel,
        out_shape=(
            jax.ShapeDtypeStruct((B, PH, CH, R, _LANE), jnp.float32),
            jax.ShapeDtypeStruct((B, PH, CH, R, _LANE), jnp.float32),
        ),
        grid=(num_tiles, nc, B),
        in_specs=[img_spec, img_spec, csm_spec, csm_spec],
        out_specs=(out_spec, out_spec),
        compiler_params=pltpu.CompilerParams(
            dimension_semantics=("parallel", "parallel", "parallel"),
            vmem_limit_bytes=vmem_limit,
        ),
        cost_estimate=cost,
    )(img_r, img_i, csm_r, csm_i)
    return out_r, out_i


@jax.jit
def _csm_fixph_forward(image, csm_r, csm_i):
    """Full forward: planar kernel + one fused interleave to complex64."""
    B, PH, D, H, W = image.shape
    CH, R = csm_r.shape[1], csm_r.shape[2]
    S = D * H * W
    out_r, out_i = _csm_fixph_planar(image, csm_r, csm_i)
    out = jax.lax.complex(out_r, out_i).reshape(B, PH, CH, R * _LANE)
    if R * _LANE != S:
        out = out[..., :S]
    return out.reshape(B, PH, CH, D, H, W)


_csm_fixph_planar_jit = jax.jit(_csm_fixph_planar)


class CSMFixPhPallas:
    """Mirror of the PyTorch CSM_FixPh module."""

    def __init__(self):
        self._csm_r = None
        self._csm_i = None
        self._spatial = None
        self._S = None

    def generate_forward_operator(self, csm_kernels):
        # csm_kernels: (Bc, 1, CH, D, H, W) complex64.  Cache the deinterleaved
        # float32 planes, padded/reshaped to (Bc, CH, R, 128), once — csm is
        # fixed across forward calls, so no per-call prep pass remains.
        assert csm_kernels.ndim == 6 and csm_kernels.shape[1] == 1
        Bc, _, CH, D, H, W = csm_kernels.shape
        S = D * H * W
        R = pl.cdiv(S, _LANE)
        pad = R * _LANE - S
        cs = csm_kernels.reshape(Bc, CH, S)
        cr = jnp.real(cs).astype(jnp.float32)
        ci = jnp.imag(cs).astype(jnp.float32)
        if pad:
            cr = jnp.pad(cr, ((0, 0), (0, 0), (0, pad)))
            ci = jnp.pad(ci, ((0, 0), (0, 0), (0, pad)))
        self._csm_r = cr.reshape(Bc, CH, R, _LANE)
        self._csm_i = ci.reshape(Bc, CH, R, _LANE)
        self._spatial = (D, H, W)
        self._S = S

    def forward_planar(self, image):
        """Planar (real, imag) outputs of shape (B, PH, CH, R, 128) — lets a
        downstream Pallas/FFT stage consume real/imag directly and skip the
        f32 -> complex64 interleave pass entirely."""
        assert tuple(image.shape[2:]) == self._spatial
        return _csm_fixph_planar_jit(image, self._csm_r, self._csm_i)

    def __call__(self, image):
        assert tuple(image.shape[2:]) == self._spatial
        return _csm_fixph_forward(image, self._csm_r, self._csm_i)


if __name__ == "__main__":
    # Small, deterministic shapes consistent with the forward pass.
    B, PH, CH, D, H, W = 2, 2, 4, 4, 8, 16

    key = jax.random.PRNGKey(0)
    k1, k2, k3, k4 = jax.random.split(key, 4)
    image = (
        jax.random.normal(k1, (B, PH, D, H, W), dtype=jnp.float32)
        + 1j * jax.random.normal(k2, (B, PH, D, H, W), dtype=jnp.float32)
    ).astype(jnp.complex64)
    csm = (
        jax.random.normal(k3, (B, 1, CH, D, H, W), dtype=jnp.float32)
        + 1j * jax.random.normal(k4, (B, 1, CH, D, H, W), dtype=jnp.float32)
    ).astype(jnp.complex64)

    model = CSMFixPhPallas()
    model.generate_forward_operator(csm)

    out = model(image)
    out = jax.block_until_ready(out)

    # Reference: image.unsqueeze(2) * csm  (broadcast complex multiply).
    ref = image[:, :, None, :, :, :] * csm
    assert out.shape == (B, PH, CH, D, H, W)
    assert out.dtype == jnp.complex64
    assert jnp.allclose(out, ref, atol=1e-5, rtol=1e-5)

    print("KERNEL_OK")
</pallas_src>

<mosaic_0001>
module attributes {stable_mosaic.version = 11 : i64} {
  func.func @_csm_mul_kernel(%arg0: i32, %arg1: i32, %arg2: i32, %arg3: memref<1x2x4x128xf32, #tpu.memory_space<vmem>>, %arg4: memref<1x2x4x128xf32, #tpu.memory_space<vmem>>, %arg5: memref<1x4x4x128xf32, #tpu.memory_space<vmem>>, %arg6: memref<1x4x4x128xf32, #tpu.memory_space<vmem>>, %arg7: memref<1x2x4x4x128xf32, #tpu.memory_space<vmem>>, %arg8: memref<1x2x4x4x128xf32, #tpu.memory_space<vmem>>) attributes {dimension_semantics = [#tpu.dimension_semantics<parallel>, #tpu.dimension_semantics<parallel>, #tpu.dimension_semantics<parallel>], iteration_bounds = array<i64: 1, 1, 2>, scalar_prefetch = 0 : i64, scratch_operands = 0 : i64, tpu.core_type = #tpu.core_type<tc>, window_params = [{transform_indices = @transform_0, window_bounds = array<i64: 1, 2, 4, 128>}, {transform_indices = @transform_1, window_bounds = array<i64: 1, 2, 4, 128>}, {transform_indices = @transform_2, window_bounds = array<i64: 1, 4, 4, 128>}, {transform_indices = @transform_3, window_bounds = array<i64: 1, 4, 4, 128>}, {transform_indices = @transform_4, window_bounds = array<i64: 1, 2, 4, 4, 128>}, {transform_indices = @transform_5, window_bounds = array<i64: 1, 2, 4, 4, 128>}]} {
    %c0 = arith.constant 0 : index
    %c0_0 = arith.constant 0 : index
    %c0_1 = arith.constant 0 : index
    %c0_2 = arith.constant 0 : index
    %0 = vector.load %arg5[%c0, %c0_0, %c0_1, %c0_2] : memref<1x4x4x128xf32, #tpu.memory_space<vmem>>, vector<1x4x4x128xf32>
    %1 = vector.shape_cast %0 : vector<1x4x4x128xf32> to vector<4x4x128xf32>
    %c0_3 = arith.constant 0 : index
    %c0_4 = arith.constant 0 : index
    %c0_5 = arith.constant 0 : index
    %c0_6 = arith.constant 0 : index
    %2 = vector.load %arg6[%c0_3, %c0_4, %c0_5, %c0_6] : memref<1x4x4x128xf32, #tpu.memory_space<vmem>>, vector<1x4x4x128xf32>
    %3 = vector.shape_cast %2 : vector<1x4x4x128xf32> to vector<4x4x128xf32>
    %c0_7 = arith.constant 0 : index
    %c0_8 = arith.constant 0 : index
    %c0_9 = arith.constant 0 : index
    %c0_10 = arith.constant 0 : index
    %4 = vector.load %arg3[%c0_7, %c0_8, %c0_9, %c0_10] : memref<1x2x4x128xf32, #tpu.memory_space<vmem>>, vector<1x1x4x128xf32>
    %5 = vector.shape_cast %4 : vector<1x1x4x128xf32> to vector<4x128xf32>
    %6 = vector.shape_cast %5 : vector<4x128xf32> to vector<1x4x128xf32>
    %c0_11 = arith.constant 0 : index
    %c0_12 = arith.constant 0 : index
    %c0_13 = arith.constant 0 : index
    %c0_14 = arith.constant 0 : index
    %7 = vector.load %arg4[%c0_11, %c0_12, %c0_13, %c0_14] : memref<1x2x4x128xf32, #tpu.memory_space<vmem>>, vector<1x1x4x128xf32>
    %8 = vector.shape_cast %7 : vector<1x1x4x128xf32> to vector<4x128xf32>
    %9 = vector.shape_cast %8 : vector<4x128xf32> to vector<1x4x128xf32>
    %10 = vector.broadcast %6 : vector<1x4x128xf32> to vector<4x4x128xf32>
    %11 = arith.mulf %10, %1 : vector<4x4x128xf32>
    %12 = vector.broadcast %9 : vector<1x4x128xf32> to vector<4x4x128xf32>
    %13 = arith.mulf %12, %3 : vector<4x4x128xf32>
    %14 = arith.subf %11, %13 : vector<4x4x128xf32>
    %c0_15 = arith.constant 0 : index
    %c0_16 = arith.constant 0 : index
    %c0_17 = arith.constant 0 : index
    %c0_18 = arith.constant 0 : index
    %c0_19 = arith.constant 0 : index
    %15 = vector.load %arg7[%c0_15, %c0_16, %c0_17, %c0_18, %c0_19] : memref<1x2x4x4x128xf32, #tpu.memory_space<vmem>>, vector<1x1x4x4x128xf32>
    %16 = vector.shape_cast %15 : vector<1x1x4x4x128xf32> to vector<4x4x128xf32>
    %17 = vector.shape_cast %14 : vector<4x4x128xf32> to vector<1x1x4x4x128xf32>
    tpu.vector_store %arg7[%c0_15, %c0_16, %c0_17, %c0_18, %c0_19], %17 {strides = array<i32>} : memref<1x2x4x4x128xf32, #tpu.memory_space<vmem>>, vector<1x1x4x4x128xf32>,
    %18 = vector.broadcast %6 : vector<1x4x128xf32> to vector<4x4x128xf32>
    %19 = arith.mulf %18, %3 : vector<4x4x128xf32>
    %20 = vector.broadcast %9 : vector<1x4x128xf32> to vector<4x4x128xf32>
    %21 = arith.mulf %20, %1 : vector<4x4x128xf32>
    %22 = arith.addf %19, %21 : vector<4x4x128xf32>
    %c0_20 = arith.constant 0 : index
    %c0_21 = arith.constant 0 : index
    %c0_22 = arith.constant 0 : index
    %c0_23 = arith.constant 0 : index
    %c0_24 = arith.constant 0 : index
    %23 = vector.load %arg8[%c0_20, %c0_21, %c0_22, %c0_23, %c0_24] : memref<1x2x4x4x128xf32, #tpu.memory_space<vmem>>, vector<1x1x4x4x128xf32>
    %24 = vector.shape_cast %23 : vector<1x1x4x4x128xf32> to vector<4x4x128xf32>
    %25 = vector.shape_cast %22 : vector<4x4x128xf32> to vector<1x1x4x4x128xf32>
    tpu.vector_store %arg8[%c0_20, %c0_21, %c0_22, %c0_23, %c0_24], %25 {strides = array<i32>} : memref<1x2x4x4x128xf32, #tpu.memory_space<vmem>>, vector<1x1x4x4x128xf32>,
    %c0_25 = arith.constant 0 : index
    %c1 = arith.constant 1 : index
    %c0_26 = arith.constant 0 : index
    %c0_27 = arith.constant 0 : index
    %26 = vector.load %arg3[%c0_25, %c1, %c0_26, %c0_27] : memref<1x2x4x128xf32, #tpu.memory_space<vmem>>, vector<1x1x4x128xf32>
    %27 = vector.shape_cast %26 : vector<1x1x4x128xf32> to vector<4x128xf32>
    %28 = vector.shape_cast %27 : vector<4x128xf32> to vector<1x4x128xf32>
    %c0_28 = arith.constant 0 : index
    %c1_29 = arith.constant 1 : index
    %c0_30 = arith.constant 0 : index
    %c0_31 = arith.constant 0 : index
    %29 = vector.load %arg4[%c0_28, %c1_29, %c0_30, %c0_31] : memref<1x2x4x128xf32, #tpu.memory_space<vmem>>, vector<1x1x4x128xf32>
    %30 = vector.shape_cast %29 : vector<1x1x4x128xf32> to vector<4x128xf32>
    %31 = vector.shape_cast %30 : vector<4x128xf32> to vector<1x4x128xf32>
    %32 = vector.broadcast %28 : vector<1x4x128xf32> to vector<4x4x128xf32>
    %33 = arith.mulf %32, %1 : vector<4x4x128xf32>
    %34 = vector.broadcast %31 : vector<1x4x128xf32> to vector<4x4x128xf32>
    %35 = arith.mulf %34, %3 : vector<4x4x128xf32>
    %36 = arith.subf %33, %35 : vector<4x4x128xf32>
    %c0_32 = arith.constant 0 : index
    %c1_33 = arith.constant 1 : index
    %c0_34 = arith.constant 0 : index
    %c0_35 = arith.constant 0 : index
    %c0_36 = arith.constant 0 : index
    %37 = vector.load %arg7[%c0_32, %c1_33, %c0_34, %c0_35, %c0_36] : memref<1x2x4x4x128xf32, #tpu.memory_space<vmem>>, vector<1x1x4x4x128xf32>
    %38 = vector.shape_cast %37 : vector<1x1x4x4x128xf32> to vector<4x4x128xf32>
    %39 = vector.shape_cast %36 : vector<4x4x128xf32> to vector<1x1x4x4x128xf32>
    tpu.vector_store %arg7[%c0_32, %c1_33, %c0_34, %c0_35, %c0_36], %39 {strides = array<i32>} : memref<1x2x4x4x128xf32, #tpu.memory_space<vmem>>, vector<1x1x4x4x128xf32>,
    %40 = vector.broadcast %28 : vector<1x4x128xf32> to vector<4x4x128xf32>
    %41 = arith.mulf %40, %3 : vector<4x4x128xf32>
    %42 = vector.broadcast %31 : vector<1x4x128xf32> to vector<4x4x128xf32>
    %43 = arith.mulf %42, %1 : vector<4x4x128xf32>
    %44 = arith.addf %41, %43 : vector<4x4x128xf32>
    %c0_37 = arith.constant 0 : index
    %c1_38 = arith.constant 1 : index
    %c0_39 = arith.constant 0 : index
    %c0_40 = arith.constant 0 : index
    %c0_41 = arith.constant 0 : index
    %45 = vector.load %arg8[%c0_37, %c1_38, %c0_39, %c0_40, %c0_41] : memref<1x2x4x4x128xf32, #tpu.memory_space<vmem>>, vector<1x1x4x4x128xf32>
    %46 = vector.shape_cast %45 : vector<1x1x4x4x128xf32> to vector<4x4x128xf32>
    %47 = vector.shape_cast %44 : vector<4x4x128xf32> to vector<1x1x4x4x128xf32>
    tpu.vector_store %arg8[%c0_37, %c1_38, %c0_39, %c0_40, %c0_41], %47 {strides = array<i32>} : memref<1x2x4x4x128xf32, #tpu.memory_space<vmem>>, vector<1x1x4x4x128xf32>,
    return
  }
  func.func @transform_0(%arg0: i32, %arg1: i32, %arg2: i32) -> (i32, i32, i32, i32) {
    %c0_i32 = arith.constant 0 : i32
    %c0_i32_0 = arith.constant 0 : i32
    %c0_i32_1 = arith.constant 0 : i32
    return %arg2, %c0_i32, %arg0, %c0_i32_0 : i32, i32, i32, i32
  }
  func.func @transform_1(%arg0: i32, %arg1: i32, %arg2: i32) -> (i32, i32, i32, i32) {
    %c0_i32 = arith.constant 0 : i32
    %c0_i32_0 = arith.constant 0 : i32
    %c0_i32_1 = arith.constant 0 : i32
    return %arg2, %c0_i32, %arg0, %c0_i32_0 : i32, i32, i32, i32
  }
  func.func @transform_2(%arg0: i32, %arg1: i32, %arg2: i32) -> (i32, i32, i32, i32) {
    %c0_i32 = arith.constant 0 : i32
    %c0_i32_0 = arith.constant 0 : i32
    return %arg2, %arg1, %arg0, %c0_i32 : i32, i32, i32, i32
  }
  func.func @transform_3(%arg0: i32, %arg1: i32, %arg2: i32) -> (i32, i32, i32, i32) {
    %c0_i32 = arith.constant 0 : i32
    %c0_i32_0 = arith.constant 0 : i32
    return %arg2, %arg1, %arg0, %c0_i32 : i32, i32, i32, i32
  }
  func.func @transform_4(%arg0: i32, %arg1: i32, %arg2: i32) -> (i32, i32, i32, i32, i32) {
    %c0_i32 = arith.constant 0 : i32
    %c0_i32_0 = arith.constant 0 : i32
    %c0_i32_1 = arith.constant 0 : i32
    return %arg2, %c0_i32, %arg1, %arg0, %c0_i32_0 : i32, i32, i32, i32, i32
  }
  func.func @transform_5(%arg0: i32, %arg1: i32, %arg2: i32) -> (i32, i32, i32, i32, i32) {
    %c0_i32 = arith.constant 0 : i32
    %c0_i32_0 = arith.constant 0 : i32
    %c0_i32_1 = arith.constant 0 : i32
    return %arg2, %c0_i32, %arg1, %arg0, %c0_i32_0 : i32, i32, i32, i32, i32
  }
}

</mosaic_0001>

<bundles_post_ra>
// kernel: custom-call.1
= control target key start
LH: loop header
LB: loop body
LE: loop exit
PB: predicated region body
PF: predicated region fallthrough
CT: control target
= control target key end

     0   :  { %s51_s0 = inlined_call_operand.hbm [shape: c64[2,2,4,8,16], index: 0, kind: input, shape index: {}]   ;;  %s52_s1 = inlined_call_operand.vmem [shape: f32[2,2,4,8,16], index: 1, kind: output, shape index: {}]  }
   0x1   :  { %s2_s8 = scalar_lea.hbm %s51_s0, 2048 }
   0x2   :  { %3 = vsyncpa [#allocation0], 0  ;;  %s4_s11 = sshll.u32 %s52_s1, 4  ;;  %s5_s11 = int_to_ptr.vmem [resolvable:$true] %s4_s11 }
   0x3   :  { %s20_s12 = scalar_lea.vmem %s5_s11, 2048  ;;  %p25_p1 = scmp.lt.s32.totalorder %s5_s11, %s5_s11 }
   0x4   :  { %p21_p0 = scmp.ne.s32.totalorder %s5_s11, %s20_s12  ;;  %p26_p2 = scmp.lt.s32.totalorder %s20_s12, %s20_s12 }
   0x6   :  { %p27_p3 = por %p26_p2, %p25_p1 }
   0x8   :  { %p28_p4 = pnand %p27_p3, %p21_p0 }
   0xa   :  { %31 = shalt.err (!%p28_p4)  }
   0xb   :  { %7 = dma.hbm_to_vmem [thread:$0]  %s2_s8, 2048, %s5_s11, [#allocation0] }
   0xc   :  { %33 = dma.done.wait [#allocation0], 2048  }
   0xd   :  { %34 = vsyncadd [#allocation0], 4294965248 }
   0xe   :  { %9 = vsyncpa [#allocation0], 1 }

// kernel: custom-call
= control target key start
LH: loop header
LB: loop body
LE: loop exit
PB: predicated region body
PF: predicated region fallthrough
CT: control target
= control target key end

     0   :  { %2 = vsyncpa [#allocation0], 0  ;;  %s47_s0 = inlined_call_operand.hbm [shape: c64[2,2,4,8,16], index: 0, kind: input, shape index: {}]   ;;  %s48_s1 = inlined_call_operand.vmem [shape: f32[2,2,4,8,16], index: 1, kind: output, shape index: {}]  }
   0x1   :  { %s3_s8 = sshll.u32 %s48_s1, 4  ;;  %s4_s8 = int_to_ptr.vmem [resolvable:$true] %s3_s8 }
   0x2   :  { %s17_s9 = scalar_lea.vmem %s4_s8, 2048  ;;  %p22_p1 = scmp.lt.s32.totalorder %s4_s8, %s4_s8 }
   0x3   :  { %p18_p0 = scmp.ne.s32.totalorder %s4_s8, %s17_s9  ;;  %p23_p2 = scmp.lt.s32.totalorder %s17_s9, %s17_s9 }
   0x5   :  { %p24_p3 = por %p23_p2, %p22_p1 }
   0x7   :  { %p25_p4 = pnand %p24_p3, %p18_p0 }
   0x9   :  { %28 = shalt.err (!%p25_p4)  }
   0xa   :  { %6 = dma.hbm_to_vmem [thread:$0]  %s47_s0, 2048, %s4_s8, [#allocation0] }
   0xb   :  { %29 = dma.done.wait [#allocation0], 2048  }
   0xc   :  { %30 = vsyncadd [#allocation0], 4294965248 }
   0xd   :  { %8 = vsyncpa [#allocation0], 1 }

// kernel: custom-call.2
= control target key start
LH: loop header
LB: loop body
LE: loop exit
PB: predicated region body
PF: predicated region fallthrough
CT: control target
= control target key end

     0   :  { %s92_s0 = inlined_call_operand.vmem [shape: f32[2,2,4,4,8,16], index: 0, kind: input, shape index: {}]   ;;  %s93_s1 = inlined_call_operand.vmem [shape: f32[2,2,4,4,8,16], index: 1, kind: input, shape index: {}]   ;;  %s94_s2 = inlined_call_operand.hbm [shape: c64[2,2,4,4,8,16], index: 2, kind: output, shape index: {}]  }
   0x1   :  { %s3_s11 = scalar_lea.hbm %s94_s2, 8192 }
   0x2   :  { %4 = vsyncpa [#allocation0], 0  ;;  %s5_s14 = sshll.u32 %s92_s0, 4  ;;  %s6_s14 = int_to_ptr.vmem [resolvable:$true] %s5_s14 }
   0x3   :  { %s18_s15 = scalar_lea.vmem %s6_s14, 8192  ;;  %p23_p1 = scmp.lt.s32.totalorder %s6_s14, %s6_s14 }
   0x4   :  { %p19_p0 = scmp.ne.s32.totalorder %s6_s14, %s18_s15  ;;  %p24_p2 = scmp.lt.s32.totalorder %s18_s15, %s18_s15 }
   0x6   :  { %p25_p3 = por %p24_p2, %p23_p1 }
   0x8   :  { %p26_p4 = pnand %p25_p3, %p19_p0 }
   0xa   :  { %29 = shalt.err (!%p26_p4)  }
   0xb   :  { %8 = dma.vmem_to_hbm [thread:$0]  %s6_s14, 8192, %s94_s2, [#allocation0] }
   0xc   :  { %61 = dma.done.wait [#allocation0], 8192  }
   0xd   :  { %62 = vsyncadd [#allocation0], 4294959104 }
   0xe   :  { %10 = vsyncpa [#allocation0], 1 }
   0xf   :  { %11 = vsyncpa [#allocation1], 0  ;;  %s12_s0 = sshll.u32 %s93_s1, 4  ;;  %s13_s0 = int_to_ptr.vmem [resolvable:$true] %s12_s0 }
  0x10   :  { %s38_s20 = scalar_lea.vmem %s13_s0, 8192  ;;  %p43_p6 = scmp.lt.s32.totalorder %s13_s0, %s13_s0 }
  0x11   :  { %p39_p5 = scmp.ne.s32.totalorder %s13_s0, %s38_s20  ;;  %p44_p7 = scmp.lt.s32.totalorder %s38_s20, %s38_s20 }
  0x13   :  { %p45_p8 = por %p44_p7, %p43_p6 }
  0x15   :  { %p46_p9 = pnand %p45_p8, %p39_p5 }
  0x17   :  { %49 = shalt.err (!%p46_p9)  }
  0x18   :  { %15 = dma.vmem_to_hbm [thread:$0]  %s13_s0, 8192, %s3_s11, [#allocation1] }
  0x19   :  { %63 = dma.done.wait [#allocation1], 8192  }
  0x1a   :  { %64 = vsyncadd [#allocation1], 4294959104 }
  0x1b   :  { %17 = vsyncpa [#allocation1], 1 }

// kernel: _csm_fixph_forward.1
= control target key start
LH: loop header
LB: loop body
LE: loop exit
PB: predicated region body
PF: predicated region fallthrough
CT: control target
= control target key end

     0   :  { %s844_s18 = smov 0   ;;  %s846_s19 = smov 0   ;;  %s918_s0 = inlined_call_operand.vmem [shape: f32[2,2,4,128], index: 0, kind: input, shape index: {}]   ;;  %s919_s1 = inlined_call_operand.vmem [shape: f32[2,2,4,128], index: 1, kind: input, shape index: {}]   ;;  %s920_s2 = inlined_call_operand.vmem [shape: f32[2,4,4,128], index: 2, kind: input, shape index: {}]   ;;  %s921_s3 = inlined_call_operand.vmem [shape: f32[2,4,4,128], index: 3, kind: input, shape index: {}]   ;;  %s922_s4 = inlined_call_operand.vmem [shape: f32[2,2,4,4,128], index: 4, kind: output, shape index: {0}]   ;;  %s923_s5 = inlined_call_operand.vmem [shape: f32[2,2,4,4,128], index: 5, kind: output, shape index: {1}]  }
   0x1   :  { %s848_s20 = smov 0  }
   0x2 LB: > { %s28_s21 = sadd.s32 1, %s808_s19  ;;  %p735_p0 = scmp.ge.s32.totalorder %s812_s20, 1  ;;  %s812_s20 = sphi %s848_s20, %s16_s20   ;;  %s808_s19 = sphi %s846_s19, %s925_s19   ;;  %s804_s18 = sphi %s844_s18, %s924_s18  }
   0x3   : > { %p29_p1 = scmp.ge.s32.totalorder %s28_s21, 2  ;;  %p281_p2 = scmp.lt.s32.totalorder %s812_s20, 3 }
   0x5   : > { %s927_s21 = smov (%p29_p1, %s28_s21), 0  ;;  %p282_p3 = pnand %p735_p0, %p281_p2 }
   0x6   : > { %p363_p4 = scmp.lt.s32.totalorder (!%p282_p3), %s804_s18, 1 }
   0x7   : > { %285 = sbr.rel (%p282_p3) target bundleno = 34 (0x22), region = 36 }
   0xc   : > { %s929_s18 = smov (!%p363_p4, %s804_s18), 1 }
   0xd   : > { %s760_s22 = sshll.u32 %s929_s18, 3  ;;  %s762_s23 = sshll.u32 %s929_s18, 4 }
   0xe   : > { %s869_s26 = scalar_lea.vmem %s918_s0, %s760_s22  ;;  %s378_s29 = scalar_lea.vmem %s919_s1, %s760_s22 }
   0xf   : > { %s390_s7 = scalar_lea.vmem %s920_s2, %s762_s23  ;;  %s403_s10 = scalar_lea.vmem %s921_s3, %s762_s23  ;;  %v439_v0 = vld [vmem:[%s869_s26] sm:$0xf]  ;;  %v748_v22 = vld [vmem:[%s869_s26 + $0x4] sm:$0xf] }
  0x10   : > { %v440_v1 = vld [vmem:[%s378_s29] sm:$0xf]  ;;  %s764_s11 = sshll.u32 %s929_s18, 5  ;;  %v432_v6 = vld [vmem:[%s390_s7 + $0x4] sm:$0xf] }
  0x11   : > { %v431_v2 = vld [vmem:[%s390_s7] sm:$0xf]  ;;  %v436_v7 = vld [vmem:[%s403_s10 + $0x4] sm:$0xf]  ;;  %v433_v8 = vld [vmem:[%s390_s7 + $0x8] sm:$0xf]  ;;  %s885_s14 = scalar_lea.vmem %s922_s4, %s764_s11  ;;  %v442_v11 = vmul.f32 %v439_v0, %v432_v6  ;;  %s890_s17 = scalar_lea.vmem %s923_s5, %s764_s11  ;;  %v462_v26 = vmul.f32 %v440_v1, %v432_v6  ;;  %v478_v37 = vmul.f32 %v748_v22, %v432_v6 }
  0x12   : > { %v435_v3 = vld [vmem:[%s403_s10] sm:$0xf]  ;;  %v441_v4 = vmul.f32 %v439_v0, %v431_v2  ;;  %v461_v10 = vmul.f32 %v440_v1, %v431_v2  ;;  %v446_v12 = vmul.f32 %v440_v1, %v436_v7  ;;  %v437_v13 = vld [vmem:[%s403_s10 + $0x8] sm:$0xf]  ;;  %v443_v14 = vmul.f32 %v439_v0, %v433_v8  ;;  %v434_v15 = vld [vmem:[%s390_s7 + $0xc] sm:$0xf] }
  0x13   : > { %v445_v5 = vmul.f32 %v440_v1, %v435_v3  ;;  %v457_v9 = vmul.f32 %v439_v0, %v435_v3  ;;  %v438_v16 = vld [vmem:[%s403_s10 + $0xc] sm:$0xf]  ;;  %v458_v17 = vmul.f32 %v439_v0, %v436_v7  ;;  %v447_v19 = vmul.f32 %v440_v1, %v437_v13  ;;  %v749_v23 = vld [vmem:[%s378_s29 + $0x4] sm:$0xf] }
  0x14   : > { %v444_v20 = vmul.f32 %v439_v0, %v434_v15  ;;  %v448_v21 = vmul.f32 %v440_v1, %v438_v16  ;;  %v450_v24 = vsub.f32 %v442_v11, %v446_v12  ;;  %v459_v27 = vmul.f32 %v439_v0, %v437_v13 }
  0x15   : > { %v449_v18 = vsub.f32 %v441_v4, %v445_v5  ;;  %v465_v25 = vadd.f32 %v461_v10, %v457_v9  ;;  %v451_v28 = vsub.f32 %v443_v14, %v447_v19  ;;  %v463_v30 = vmul.f32 %v440_v1, %v433_v8 }
  0x16   : > { %v452_v29 = vsub.f32 %v444_v20, %v448_v21  ;;  %v460_v31 = vmul.f32 %v439_v0, %v438_v16  ;;  %454 = vst [vmem:[%s885_s14 + $0x4] sm:$0xf] %v450_v24  ;;  %v466_v32 = vadd.f32 %v462_v26, %v458_v17  ;;  %v464_v33 = vmul.f32 %v440_v1, %v434_v15 }
  0x17   : > { %453 = vst [vmem:[%s885_s14] sm:$0xf] %v449_v18  ;;  %469 = vst [vmem:[%s890_s17] sm:$0xf] %v465_v25  ;;  %v477_v34 = vmul.f32 %v748_v22, %v431_v2  ;;  %v481_v35 = vmul.f32 %v749_v23, %v435_v3  ;;  %v467_v36 = vadd.f32 %v463_v30, %v459_v27 }
  0x18   : > { %455 = vst [vmem:[%s885_s14 + $0x8] sm:$0xf] %v451_v28  ;;  %456 = vst [vmem:[%s885_s14 + $0xc] sm:$0xf] %v452_v29  ;;  %v482_v38 = vmul.f32 %v749_v23, %v436_v7  ;;  %v479_v39 = vmul.f32 %v748_v22, %v433_v8  ;;  %v468_v40 = vadd.f32 %v464_v33, %v460_v31 }
  0x19   : > { %470 = vst [vmem:[%s890_s17 + $0x4] sm:$0xf] %v466_v32  ;;  %v485_v41 = vsub.f32 %v477_v34, %v481_v35  ;;  %v483_v42 = vmul.f32 %v749_v23, %v437_v13  ;;  %v480_v43 = vmul.f32 %v748_v22, %v434_v15  ;;  %471 = vst [vmem:[%s890_s17 + $0x8] sm:$0xf] %v467_v36 }
  0x1a   : > { %v486_v44 = vsub.f32 %v478_v37, %v482_v38  ;;  %v484_v45 = vmul.f32 %v749_v23, %v438_v16  ;;  %v494_v46 = vmul.f32 %v748_v22, %v435_v3  ;;  %v498_v47 = vmul.f32 %v749_v23, %v431_v2  ;;  %472 = vst [vmem:[%s890_s17 + $0xc] sm:$0xf] %v468_v40 }
  0x1b   : > { %750 = vst [vmem:[%s885_s14 + $0x10] sm:$0xf] %v485_v41  ;;  %v487_v48 = vsub.f32 %v479_v39, %v483_v42  ;;  %v495_v49 = vmul.f32 %v748_v22, %v436_v7  ;;  %v499_v50 = vmul.f32 %v749_v23, %v432_v6  ;;  %v496_v51 = vmul.f32 %v748_v22, %v437_v13 }
  0x1c   : > { %751 = vst [vmem:[%s885_s14 + $0x14] sm:$0xf] %v486_v44  ;;  %v488_v52 = vsub.f32 %v480_v43, %v484_v45  ;;  %v502_v53 = vadd.f32 %v498_v47, %v494_v46  ;;  %v500_v54 = vmul.f32 %v749_v23, %v433_v8  ;;  %v497_v55 = vmul.f32 %v748_v22, %v438_v16 }
  0x1d   : > { %752 = vst [vmem:[%s885_s14 + $0x18] sm:$0xf] %v487_v48  ;;  %v503_v56 = vadd.f32 %v499_v50, %v495_v49  ;;  %v501_v57 = vmul.f32 %v749_v23, %v434_v15 }
  0x1e   : > { %753 = vst [vmem:[%s885_s14 + $0x1c] sm:$0xf] %v488_v52  ;;  %754 = vst [vmem:[%s890_s17 + $0x10] sm:$0xf] %v502_v53  ;;  %v504_v58 = vadd.f32 %v500_v54, %v496_v51 }
  0x1f   : > { %755 = vst [vmem:[%s890_s17 + $0x14] sm:$0xf] %v503_v56  ;;  %v505_v59 = vadd.f32 %v501_v57, %v497_v55 }
  0x20   : > { %756 = vst [vmem:[%s890_s17 + $0x18] sm:$0xf] %v504_v58 }
  0x21   : > { %757 = vst [vmem:[%s890_s17 + $0x1c] sm:$0xf] %v505_v59 }
  0x22 PF: > { %s16_s20 = sadd.s32 1, %s812_s20   ;;  %s924_s18 = smov %s808_s19 }
  0x23   : > { %p13_p5 = scmp.ge.s32.totalorder %s16_s20, 4   ;;  %s925_s19 = smov %s927_s21 }
  0x25   :  { %15 = sbr.rel (!%p13_p5) target bundleno = 2 (0x2), region = 91 }

</bundles_post_ra>
